<compile_context>
chip_gen: v7x
topology: tpu7x:2x2x1
jax: 0.10.0
libtpu: 0.0.40
codegen_flags: <defaults>
</compile_context>

<pallas_src>
import functools

import jax
import jax.numpy as jnp
from jax.experimental import pallas as pl
from jax.experimental.pallas import tpu as pltpu

LANE = 128              # vreg lane width; all feature dims are zero-padded to this
ONES_LANE = LANE - 1    # reserved padding lane carrying a constant 1.0 (bias fold)
NEG_SLOPE = 0.1         # LeakyReLU negative slope used by the module
BN_EPS = 1e-5           # nn.BatchNorm1d default eps
L2_EPS = 1e-12          # F.normalize default eps


# -----------------------------------------------------------------------------
# Shared math: traced inside the Pallas kernel AND reused as the
# numerics-matched pure-JAX reference (identical bf16 casts / f32 accumulation).
# -----------------------------------------------------------------------------
def _rgcn_layer(h, adj_cat, w_blk, *, leaky):
    """One fused RGCNConv (+ folded BN) + LeakyReLU layer.

    h:       (N, 128)        node features; lane ONES_LANE carries 1.0
    adj_cat: (N, R_TOT*N)    bf16, lane-concatenated [A_0 | ... | A_{R-1} | I]
    w_blk:   (R_TOT,128,128) bf16; slot R_TOT-1 is the root weight with the
             bias stored in row ONES_LANE (and [ONES_LANE, ONES_LANE] = 1 on
             non-final layers so the ones lane survives to the next layer).
    """
    r_tot = w_blk.shape[0]
    n = h.shape[0]
    hb = h.astype(jnp.bfloat16)
    # ONE batched MXU matmul produces every relation transform plus the root
    # transform (+ bias via the ones lane), already sublane-stacked.
    hb_b = jnp.broadcast_to(hb, (r_tot, n, LANE))
    xw = jax.lax.dot_general(
        hb_b, w_blk,
        dimension_numbers=(((2,), (1,)), ((0,), (0,))),
        preferred_element_type=jnp.float32)               # (R_TOT, N, 128) f32
    # Layout-free collapse: N == bf16 sublane tile (16), so (R_TOT,N,128) and
    # (R_TOT*N,128) have identical vreg layout.
    xw_s = xw.astype(jnp.bfloat16).reshape(r_tot * n, LANE)
    # ONE aggregation matmul with K = R_TOT*N replaces the R tiny K=N matmuls,
    # the separate root matmul, and the msg + root + bias adds.
    acc = jnp.dot(adj_cat, xw_s, preferred_element_type=jnp.float32)
    if leaky:
        acc = jnp.maximum(acc, NEG_SLOPE * acc)            # LeakyReLU: single vmax
    return acc


def _l2_normalize(h):
    # Padded feature columns (incl. the ones lane on the final layer) are zero,
    # so the norm over 128 lanes equals the norm over the real columns.
    nrm2 = jnp.sum(h * h, axis=1, keepdims=True)
    return h * jax.lax.rsqrt(jnp.maximum(nrm2, L2_EPS * L2_EPS))


def _fused_forward(x_p, adj_cat, w_packed):
    h = x_p
    n_layers = w_packed.shape[0]
    for i in range(n_layers):
        h = _rgcn_layer(h, adj_cat, w_packed[i], leaky=(i < n_layers - 1))
    return _l2_normalize(h)


# -----------------------------------------------------------------------------
# Pallas kernel: the whole 3-layer forward in one invocation (no grid).
# -----------------------------------------------------------------------------
def rgcn_fused_kernel(x_ref, adj_ref, w_ref, o_ref):
    adj_cat = adj_ref[...]
    h = x_ref[...]
    n_layers = w_ref.shape[0]
    for i in range(n_layers):                              # static unroll, 3 layers
        h = _rgcn_layer(h, adj_cat, w_ref[i], leaky=(i < n_layers - 1))
    o_ref[...] = _l2_normalize(h)


@functools.partial(jax.jit, static_argnames=("out_dim",))
def rgcn_forward_fused(x_p, adj_cat, w_packed, *, out_dim):
    n = x_p.shape[0]
    n_layers, r_tot, _, _ = w_packed.shape
    vmem = pl.BlockSpec(memory_space=pltpu.MemorySpace.VMEM)
    flops = n_layers * (2 * r_tot * n * LANE * LANE        # batched transforms
                        + 2 * n * (r_tot * n) * LANE)      # aggregation matmul
    bytes_accessed = (x_p.size * x_p.dtype.itemsize
                      + adj_cat.size * adj_cat.dtype.itemsize
                      + w_packed.size * w_packed.dtype.itemsize
                      + n * LANE * 4)
    out_p = pl.pallas_call(
        rgcn_fused_kernel,
        out_shape=jax.ShapeDtypeStruct((n, LANE), jnp.float32),
        in_specs=[vmem, vmem, vmem],
        out_specs=vmem,
        cost_estimate=pl.CostEstimate(
            flops=flops, transcendentals=n, bytes_accessed=bytes_accessed),
    )(x_p, adj_cat, w_packed)
    return out_p[:, :out_dim]


# -----------------------------------------------------------------------------
# Host-side preparation: BN fold, padding, bias/root folding, packing, bf16 cast.
# -----------------------------------------------------------------------------
def fold_bn_eval(w_rel, w_root, bias, gamma, beta, mean, var):
    scale = gamma / jnp.sqrt(var + BN_EPS)                 # (f_out,)
    return (w_rel * scale[None, None, :],
            w_root * scale[None, :],
            (bias - mean) * scale + beta)


def prepare_layer_block(w_rel, w_root, bias, bn=None, *, last=False):
    """One (R_TOT, 128, 128) bf16 weight block per layer.

    Slots 0..R-1 hold the zero-padded per-relation weights; slot R holds the
    root/self-loop weight with the (BN-folded) bias written into row ONES_LANE
    (injected via the constant-1.0 ones lane of h) and, for non-final layers,
    a 1.0 at [ONES_LANE, ONES_LANE] so the ones lane propagates.
    """
    if bn is not None:
        w_rel, w_root, bias = fold_bn_eval(w_rel, w_root, bias, *bn)
    n_rel, f_in, f_out = w_rel.shape
    assert f_in <= ONES_LANE and f_out <= ONES_LANE, "feature dims must stay below the ones lane"
    blk = jnp.zeros((n_rel + 1, LANE, LANE), jnp.float32)
    blk = blk.at[:n_rel, :f_in, :f_out].set(w_rel)
    blk = blk.at[n_rel, :f_in, :f_out].set(w_root)          # root / self-loop slot
    blk = blk.at[n_rel, ONES_LANE, :f_out].set(bias)         # bias via the ones lane
    if not last:
        blk = blk.at[n_rel, ONES_LANE, ONES_LANE].set(1.0)   # keep ones lane alive
    return blk.astype(jnp.bfloat16)


def prepare_adjacency(adj):
    """Lane-concatenated [A_0 | ... | A_{R-1} | I] of shape (N, (R+1)*N), bf16."""
    n_rel, n, _ = adj.shape
    blocks = [adj[r] for r in range(n_rel)] + [jnp.eye(n, dtype=jnp.float32)]
    return jnp.concatenate(blocks, axis=1).astype(jnp.bfloat16)


def prepare_x(x):
    n, f_in = x.shape
    assert f_in <= ONES_LANE
    x_p = jnp.zeros((n, LANE), jnp.float32).at[:, :f_in].set(x)
    x_p = x_p.at[:, ONES_LANE].set(1.0)                     # ones lane (bias fold)
    return x_p.astype(jnp.bfloat16)


# -----------------------------------------------------------------------------
# Glue: dense per-relation mean-normalized adjacency (PyG RGCNConv aggr='mean').
# -----------------------------------------------------------------------------
def build_rel_adj(edge_index, edge_type, num_nodes, num_relations):
    src = edge_index[0].astype(jnp.int32)
    dst = edge_index[1].astype(jnp.int32)
    adj = jnp.zeros((num_relations, num_nodes, num_nodes), jnp.float32)
    adj = adj.at[edge_type.astype(jnp.int32), dst, src].add(1.0)
    deg = adj.sum(axis=2, keepdims=True)                    # incoming edges per relation
    return adj / jnp.maximum(deg, 1.0)                      # mean aggregation


# -----------------------------------------------------------------------------
# Parameter setup (deterministic, synthetic)
# -----------------------------------------------------------------------------
def glorot(key, shape):
    fan_in, fan_out = shape[-2], shape[-1]
    limit = (6.0 / (fan_in + fan_out)) ** 0.5
    return jax.random.uniform(key, shape, jnp.float32, -limit, limit)


def init_rgcn_layer(key, f_in, f_out, num_relations, num_bases):
    k_basis, k_comp, k_root, k_bias = jax.random.split(key, 4)
    basis = glorot(k_basis, (num_bases, f_in, f_out))
    comp = glorot(k_comp, (num_relations, num_bases))
    w_rel = jnp.einsum("rb,bio->rio", comp, basis)          # (R, f_in, f_out)
    w_root = glorot(k_root, (f_in, f_out))
    bias = 0.05 * jax.random.normal(k_bias, (f_out,), jnp.float32)
    return w_rel, w_root, bias


def init_bn_state(key, dim):
    """Eval-mode BatchNorm1d params + synthetic (as-if-trained) running stats."""
    k_g, k_b, k_m, k_v = jax.random.split(key, 4)
    gamma = jax.random.uniform(k_g, (dim,), jnp.float32, 0.5, 1.5)
    beta = 0.1 * jax.random.normal(k_b, (dim,), jnp.float32)
    mean = 0.1 * jax.random.normal(k_m, (dim,), jnp.float32)
    var = jax.random.uniform(k_v, (dim,), jnp.float32, 0.5, 1.5)
    return gamma, beta, mean, var


# -----------------------------------------------------------------------------
# Module-faithful float32 reference (explicit BN, per-relation einsum).
# -----------------------------------------------------------------------------
def rgcn_forward_ref(x, adj, raw_params):
    (w1, r1, b1), bn1, (w2, r2, b2), bn2, (w3, r3, b3) = raw_params

    def conv(h, w_rel, w_root, bias):
        msg = jnp.einsum("rds,sf,rfo->do", adj, h, w_rel)
        return msg + h @ w_root + bias

    def bn_lrelu(h, bn):
        gamma, beta, mean, var = bn
        y = (h - mean) / jnp.sqrt(var + BN_EPS) * gamma + beta
        return jnp.where(y >= 0, y, NEG_SLOPE * y)

    h = bn_lrelu(conv(x, w1, r1, b1), bn1)
    h = bn_lrelu(conv(h, w2, r2, b2), bn2)
    h = conv(h, w3, r3, b3)
    return h / jnp.maximum(jnp.linalg.norm(h, axis=1, keepdims=True), L2_EPS)


# -----------------------------------------------------------------------------
if __name__ == "__main__":
    key = jax.random.PRNGKey(0)
    N, E = 16, 40                                   # nodes, edges
    in_dim, hidden_dim, out_dim = 8, 32, 16
    num_relations = 3
    num_bases = min(num_relations, hidden_dim)      # module default

    (k_x, k_src, k_dst, k_et,
     k_l1, k_l2, k_l3, k_bn1, k_bn2) = jax.random.split(key, 9)

    x = jax.random.normal(k_x, (N, in_dim), jnp.float32)
    edge_index = jnp.stack(
        [jax.random.randint(k_src, (E,), 0, N),
         jax.random.randint(k_dst, (E,), 0, N)], axis=0)
    edge_type = jax.random.randint(k_et, (E,), 0, num_relations)

    adj = build_rel_adj(edge_index, edge_type, N, num_relations)

    layer1 = init_rgcn_layer(k_l1, in_dim, hidden_dim, num_relations, num_bases)
    layer2 = init_rgcn_layer(k_l2, hidden_dim, hidden_dim, num_relations, num_bases)
    layer3 = init_rgcn_layer(k_l3, hidden_dim, out_dim, num_relations, num_bases)
    bn1 = init_bn_state(k_bn1, hidden_dim)
    bn2 = init_bn_state(k_bn2, hidden_dim)

    # Host prep: BN fold, 128-lane padding, ones-lane bias fold, root-as-extra-
    # relation fold, relation/root weight packing (one bf16 buffer), bf16 cast.
    w_packed = jnp.stack([
        prepare_layer_block(*layer1, bn=bn1, last=False),
        prepare_layer_block(*layer2, bn=bn2, last=False),
        prepare_layer_block(*layer3, bn=None, last=True),
    ])                                              # (3, R+1, 128, 128) bf16
    adj_cat = prepare_adjacency(adj)                # (N, (R+1)*N) bf16
    x_p = prepare_x(x)                              # (N, 128) bf16

    out = rgcn_forward_fused(x_p, adj_cat, w_packed, out_dim=out_dim)
    out = jax.block_until_ready(out)
    assert out.shape == (N, out_dim)

    # 1) numerics-matched pure-JAX reference (same fold / padding / bf16 casts):
    #    tight check of the Pallas lowering.
    ref_matched = _fused_forward(x_p, adj_cat, w_packed)[:, :out_dim]
    assert jnp.allclose(out, ref_matched, rtol=3e-3, atol=1e-3), \
        "mismatch vs numerics-matched reference"

    # 2) module-faithful float32 reference (explicit eval-mode BN, per-relation
    #    einsum); looser tolerance accounts for bf16 MXU inputs in the kernel.
    ref_f32 = rgcn_forward_ref(x, adj, (layer1, bn1, layer2, bn2, layer3))
    assert jnp.allclose(out, ref_f32, rtol=5e-2, atol=1e-2), \
        "mismatch vs float32 module reference"

    print("KERNEL_OK")
</pallas_src>

<mosaic_0001>
module attributes {stable_mosaic.version = 11 : i64} {
  func.func @rgcn_fused_kernel(%arg0: memref<16x128xbf16, #tpu.memory_space<vmem>>, %arg1: memref<16x64xbf16, #tpu.memory_space<vmem>>, %arg2: memref<3x4x128x128xbf16, #tpu.memory_space<vmem>>, %arg3: memref<16x128xf32, #tpu.memory_space<vmem>>) attributes {dimension_semantics = [], scalar_prefetch = 0 : i64, scratch_operands = 0 : i64, tpu.core_type = #tpu.core_type<tc>} {
    %c0 = arith.constant 0 : index
    %c0_0 = arith.constant 0 : index
    %0 = vector.load %arg1[%c0, %c0_0] : memref<16x64xbf16, #tpu.memory_space<vmem>>, vector<16x64xbf16>
    %c0_1 = arith.constant 0 : index
    %c0_2 = arith.constant 0 : index
    %1 = vector.load %arg0[%c0_1, %c0_2] : memref<16x128xbf16, #tpu.memory_space<vmem>>, vector<16x128xbf16>
    %c0_3 = arith.constant 0 : index
    %c0_4 = arith.constant 0 : index
    %c0_5 = arith.constant 0 : index
    %c0_6 = arith.constant 0 : index
    %2 = vector.load %arg2[%c0_3, %c0_4, %c0_5, %c0_6] : memref<3x4x128x128xbf16, #tpu.memory_space<vmem>>, vector<1x4x128x128xbf16>
    %3 = vector.shape_cast %2 : vector<1x4x128x128xbf16> to vector<4x128x128xbf16>
    %4 = vector.shape_cast %1 : vector<16x128xbf16> to vector<1x16x128xbf16>
    %5 = vector.broadcast %4 : vector<1x16x128xbf16> to vector<4x16x128xbf16>
    %cst = arith.constant dense<0.000000e+00> : vector<4x16x128xf32>
    %6 = tpu.matmul %5, %3, %cst {dimension_numbers = #tpu.dot_dimension_numbers<[2], [1], [1], [2], [0, 0, 0, 1, 1, 2], [0], [0]>} : vector<4x16x128xbf16>, vector<4x128x128xbf16>, vector<4x16x128xf32> -> vector<4x16x128xf32>
    %7 = arith.truncf %6 : vector<4x16x128xf32> to vector<4x16x128xbf16>
    %8 = vector.shape_cast %7 : vector<4x16x128xbf16> to vector<64x128xbf16>
    %cst_7 = arith.constant dense<0.000000e+00> : vector<16x128xf32>
    %9 = tpu.matmul %0, %8, %cst_7 {dimension_numbers = #tpu.dot_dimension_numbers<[1], [0], [0], [1], [0, 0, 1, 1], [], []>} : vector<16x64xbf16>, vector<64x128xbf16>, vector<16x128xf32> -> vector<16x128xf32>
    %cst_8 = arith.constant 1.000000e-01 : f32
    %10 = vector.broadcast %cst_8 : f32 to vector<16x128xf32>
    %11 = arith.mulf %10, %9 : vector<16x128xf32>
    %12 = arith.maximumf %9, %11 : vector<16x128xf32>
    %c1 = arith.constant 1 : index
    %c0_9 = arith.constant 0 : index
    %c0_10 = arith.constant 0 : index
    %c0_11 = arith.constant 0 : index
    %13 = vector.load %arg2[%c1, %c0_9, %c0_10, %c0_11] : memref<3x4x128x128xbf16, #tpu.memory_space<vmem>>, vector<1x4x128x128xbf16>
    %14 = vector.shape_cast %13 : vector<1x4x128x128xbf16> to vector<4x128x128xbf16>
    %15 = arith.truncf %12 : vector<16x128xf32> to vector<16x128xbf16>
    %16 = vector.shape_cast %15 : vector<16x128xbf16> to vector<1x16x128xbf16>
    %17 = vector.broadcast %16 : vector<1x16x128xbf16> to vector<4x16x128xbf16>
    %cst_12 = arith.constant dense<0.000000e+00> : vector<4x16x128xf32>
    %18 = tpu.matmul %17, %14, %cst_12 {dimension_numbers = #tpu.dot_dimension_numbers<[2], [1], [1], [2], [0, 0, 0, 1, 1, 2], [0], [0]>} : vector<4x16x128xbf16>, vector<4x128x128xbf16>, vector<4x16x128xf32> -> vector<4x16x128xf32>
    %19 = arith.truncf %18 : vector<4x16x128xf32> to vector<4x16x128xbf16>
    %20 = vector.shape_cast %19 : vector<4x16x128xbf16> to vector<64x128xbf16>
    %cst_13 = arith.constant dense<0.000000e+00> : vector<16x128xf32>
    %21 = tpu.matmul %0, %20, %cst_13 {dimension_numbers = #tpu.dot_dimension_numbers<[1], [0], [0], [1], [0, 0, 1, 1], [], []>} : vector<16x64xbf16>, vector<64x128xbf16>, vector<16x128xf32> -> vector<16x128xf32>
    %cst_14 = arith.constant 1.000000e-01 : f32
    %22 = vector.broadcast %cst_14 : f32 to vector<16x128xf32>
    %23 = arith.mulf %22, %21 : vector<16x128xf32>
    %24 = arith.maximumf %21, %23 : vector<16x128xf32>
    %c2 = arith.constant 2 : index
    %c0_15 = arith.constant 0 : index
    %c0_16 = arith.constant 0 : index
    %c0_17 = arith.constant 0 : index
    %25 = vector.load %arg2[%c2, %c0_15, %c0_16, %c0_17] : memref<3x4x128x128xbf16, #tpu.memory_space<vmem>>, vector<1x4x128x128xbf16>
    %26 = vector.shape_cast %25 : vector<1x4x128x128xbf16> to vector<4x128x128xbf16>
    %27 = arith.truncf %24 : vector<16x128xf32> to vector<16x128xbf16>
    %28 = vector.shape_cast %27 : vector<16x128xbf16> to vector<1x16x128xbf16>
    %29 = vector.broadcast %28 : vector<1x16x128xbf16> to vector<4x16x128xbf16>
    %cst_18 = arith.constant dense<0.000000e+00> : vector<4x16x128xf32>
    %30 = tpu.matmul %29, %26, %cst_18 {dimension_numbers = #tpu.dot_dimension_numbers<[2], [1], [1], [2], [0, 0, 0, 1, 1, 2], [0], [0]>} : vector<4x16x128xbf16>, vector<4x128x128xbf16>, vector<4x16x128xf32> -> vector<4x16x128xf32>
    %31 = arith.truncf %30 : vector<4x16x128xf32> to vector<4x16x128xbf16>
    %32 = vector.shape_cast %31 : vector<4x16x128xbf16> to vector<64x128xbf16>
    %cst_19 = arith.constant dense<0.000000e+00> : vector<16x128xf32>
    %33 = tpu.matmul %0, %32, %cst_19 {dimension_numbers = #tpu.dot_dimension_numbers<[1], [0], [0], [1], [0, 0, 1, 1], [], []>} : vector<16x64xbf16>, vector<64x128xbf16>, vector<16x128xf32> -> vector<16x128xf32>
    %34 = arith.mulf %33, %33 : vector<16x128xf32>
    %cst_20 = arith.constant dense<0.000000e+00> : vector<16xf32>
    %35 = vector.multi_reduction <add>, %34, %cst_20 [1] : vector<16x128xf32> to vector<16xf32>
    %36 = vector.shape_cast %35 : vector<16xf32> to vector<16x1xf32>
    %cst_21 = arith.constant 1.000000e-24 : f32
    %37 = vector.broadcast %cst_21 : f32 to vector<16x1xf32>
    %38 = arith.maximumf %36, %37 : vector<16x1xf32>
    %39 = math.rsqrt %38 : vector<16x1xf32>
    %40 = vector.broadcast %39 : vector<16x1xf32> to vector<16x128xf32>
    %41 = arith.mulf %33, %40 : vector<16x128xf32>
    %c0_22 = arith.constant 0 : index
    %c0_23 = arith.constant 0 : index
    %42 = vector.load %arg3[%c0_22, %c0_23] : memref<16x128xf32, #tpu.memory_space<vmem>>, vector<16x128xf32>
    tpu.vector_store %arg3[%c0_22, %c0_23], %41 {strides = array<i32>} : memref<16x128xf32, #tpu.memory_space<vmem>>, vector<16x128xf32>,
    return
  }
}

</mosaic_0001>

<bundles_post_ra>
// kernel: rgcn_forward_fused.1
= control target key start
LH: loop header
LB: loop body
LE: loop exit
PB: predicated region body
PF: predicated region fallthrough
CT: control target
= control target key end

     0   :  { %8 = vsyncpa [#allocation3], 0  ;;  %s2461_s0 = inlined_call_operand.hbm [shape: bf16[16,128], index: 0, kind: input, shape index: {}]   ;;  %s2462_s1 = inlined_call_operand.hbm [shape: bf16[16,64], index: 1, kind: input, shape index: {}]   ;;  %s2463_s2 = inlined_call_operand.hbm [shape: bf16[3,4,128,128], index: 2, kind: input, shape index: {}]   ;;  %s2464_s3 = inlined_call_operand.hbm [shape: f32[16,128], index: 3, kind: output, shape index: {}]  }
   0x1   :  { %9 = vsyncpa [#allocation6], 0 }
   0x2   :  { %10 = vsyncpa [#allocation4], 0  ;;  %s2221_s12 = smov [#allocation5]   ;;  %s2222_s14 = smov [#allocation2]  }
   0x3   :  { %s28_s13 = sshll.u32 %s2221_s12, 4  ;;  %s16_s15 = sshll.u32 %s2222_s14, 4  ;;  %s29_s13 = int_to_ptr.vmem [resolvable:$true] %s28_s13  ;;  %s2251_s15 = int_to_ptr.vmem [resolvable:$true] %s16_s15 }
   0x4   :  { %s2127_s18 = scalar_lea.hbm %s2462_s1, 128 }
   0x5   :  { %p2128_p0 = scmp.ne.s32.totalorder %s2462_s1, %s2127_s18  ;;  %p2131_p1 = scmp.lt.u32.totalorder %s2127_s18, %s2462_s1 }
   0x7   :  { %p2133_p2 = pnand %p2131_p1, %p2128_p0 }
   0x9   :  { %2136 = shalt.err (!%p2133_p2)
}
   0xa   :  { %s2137_s23 = scalar_lea.vmem %s29_s13, 128  ;;  %p2142_p4 = scmp.lt.s32.totalorder %s29_s13, %s29_s13 }
   0xb   :  { %p2138_p3 = scmp.ne.s32.totalorder %s29_s13, %s2137_s23  ;;  %p2143_p5 = scmp.lt.s32.totalorder %s2137_s23, %s2137_s23 }
   0xd   :  { %p2144_p6 = por %p2143_p5, %p2142_p4 }
   0xf   :  { %p2145_p7 = pnand %p2144_p6, %p2138_p3 }
  0x11   :  { %2148 = shalt.err (!%p2145_p7)
}
  0x12   :  { %s2223_s24 = smov 64   ;;  %s2224_s25 = smov 4  }
  0x13   :  { %34 = dma.hbm_to_vmem [thread:$0]  %s2462_s1, 128, %s29_s13, [#allocation6], %s2223_s24, %s2223_s24, %s2224_s25  }
  0x14   :  { %s2149_s30 = scalar_lea.hbm %s2461_s0, 128 }
  0x15   :  { %p2150_p8 = scmp.ne.s32.totalorder %s2461_s0, %s2149_s30  ;;  %p2153_p9 = scmp.lt.u32.totalorder %s2149_s30, %s2461_s0 }
  0x17   :  { %p2155_p10 = pnand %p2153_p9, %p2150_p8 }
  0x19   :  { %2158 = shalt.err (!%p2155_p10)
}
  0x1a   :  { %s2159_s8 = scalar_lea.vmem %s2251_s15, 128  ;;  %p2164_p12 = scmp.lt.s32.totalorder %s2251_s15, %s2251_s15 }
  0x1b   :  { %p2160_p11 = scmp.ne.s32.totalorder %s2251_s15, %s2159_s8  ;;  %p2165_p13 = scmp.lt.s32.totalorder %s2159_s8, %s2159_s8 }
  0x1d   :  { %p2166_p0 = por %p2165_p13, %p2164_p12 }
  0x1f   :  { %p2167_p1 = pnand %p2166_p0, %p2160_p11 }
  0x21   :  { %2170 = shalt.err (!%p2167_p1)
}
  0x22   :  { %22 = dma.hbm_to_vmem [thread:$0]  %s2461_s0, 128, %s2251_s15, [#allocation3], %s2223_s24, %s2223_s24, %s2224_s25  }
  0x23   :  { %s2225_s10 = smov [#allocation7]   ;;  %s2171_s14 = scalar_lea.hbm %s2463_s2, 12288 }
  0x24   :  { %s40_s11 = sshll.u32 %s2225_s10, 4  ;;  %p2172_p2 = scmp.ne.s32.totalorder %s2463_s2, %s2171_s14  ;;  %s41_s11 = int_to_ptr.vmem [resolvable:$true] %s40_s11 }
  0x25   :  { %p2175_p3 = scmp.lt.u32.totalorder %s2171_s14, %s2463_s2 }
  0x27   :  { %p2177_p4 = pnand %p2175_p3, %p2172_p2 }
  0x29   :  { %2180 = shalt.err (!%p2177_p4)
}
  0x2a   :  { %s2181_s20 = scalar_lea.vmem %s41_s11, 12288  ;;  %p2186_p6 = scmp.lt.s32.totalorder %s41_s11, %s41_s11 }
  0x2b   :  { %p2182_p5 = scmp.ne.s32.totalorder %s41_s11, %s2181_s20  ;;  %p2187_p7 = scmp.lt.s32.totalorder %s2181_s20, %s2181_s20 }
  0x2d   :  { %p2188_p8 = por %p2187_p7, %p2186_p6 }
  0x2f   :  { %p2189_p9 = pnand %p2188_p8, %p2182_p5 }
  0x31   :  { %2192 = shalt.err (!%p2189_p9)
}
  0x32   :  { %46 = dma.hbm_to_vmem [thread:$0]  %s2463_s2, 12288, %s41_s11, [#allocation6], %s2223_s24, %s2223_s24, %s2224_s25  }
  0x33   :  { %2215 = dma.done.wait [#allocation3], 128  }
  0x34   :  { %2216 = vsyncadd [#allocation3], 4294967168 }
  0x35   :  { %2217 = dma.done.wait [#allocation6], 12416  }
  0x36   :  { %2218 = vsyncadd [#allocation6], 4294954880  ;;  %v2226_v0 = vmov 0.0   ;;  %vm2227_vm0 = vmmov 0   ;;  %v2025_v1 = vld [vmem:[#allocation7] sm:$0xff]   ;;  %v2027_v3 = vld [vmem:[#allocation7 + $0x8] sm:$0xff]  }
  0x37   :  { %1739 = vmatprep.subr.bf16.mxu0 %v2226_v0  ;;  %1759 = vmatprep.subr.bf16.mxu1 %v2226_v0  ;;  %v2026_v2 = vld [vmem:[#allocation7 + $0x40] sm:$0xff]   ;;  %v2028_v4 = vld [vmem:[#allocation7 + $0x48] sm:$0xff]   ;;  %v2029_v5 = vld [vmem:[#allocation7 + $0x10] sm:$0xff]   ;;  %vm496_vm1 = vcmask 523264   ;;  %s2228_s2 = smov [#allocation8]  }
  0x38   :  { %1755 = vmatprep.mubr.msk.bf16.mxu0 %vm2227_vm0, %v2226_v0  ;;  %1775 = vmatprep.mubr.msk.bf16.mxu1 %vm2227_vm0, %v2226_v0  ;;  %v2030_v6 = vld [vmem:[#allocation7 + $0x50] sm:$0xff]   ;;  %v2031_v7 = vld [vmem:[#allocation7 + $0x18] sm:$0xff]   ;;  %v2033_v9 = vld [vmem:[#allocation7 + $0x20] sm:$0xff]   ;;  %s1502_s21 = sshll.u32 %s2228_s2, 4  ;;  %s1503_s21 = int_to_ptr.vmem [resolvable:$true] %s1502_s21 }
  0x39   :  { %1740 = vmatpush3.bf16.msra.mxu0 %v2025_v1  ;;  %1760 = vmatpush3.bf16.msra.mxu1 %v2026_v2  ;;  %v2032_v8 = vld [vmem:[#allocation7 + $0x58] sm:$0xff]   ;;  %v2034_v10 = vld [vmem:[#allocation7 + $0x60] sm:$0xff]   ;;  %v2035_v11 = vld [vmem:[#allocation7 + $0x28] sm:$0xff]   ;;  %s2193_s22 = scalar_lea.vmem %s1503_s21, 256  ;;  %p2198_p11 = scmp.lt.s32.totalorder %s1503_s21, %s1503_s21 }
  0x3a   :  { %1741 = vmatprep.subr.bf16.mxu0 %v2226_v0  ;;  %1761 = vmatprep.subr.bf16.mxu1 %v2226_v0  ;;  %v2036_v12 = vld [vmem:[#allocation7 + $0x68] sm:$0xff]   ;;  %v2037_v13 = vld [vmem:[#allocation7 + $0x30] sm:$0xff]   ;;  %v2039_v15 = vld [vmem:[#allocation7 + $0x38] sm:$0xff]   ;;  %p2194_p10 = scmp.ne.s32.totalorder %s1503_s21, %s2193_s22  ;;  %p2199_p12 = scmp.lt.s32.totalorder %s2193_s22, %s2193_s22 }
  0x3b   :  { %v2038_v14 = vld [vmem:[#allocation7 + $0x70] sm:$0xff]   ;;  %v2040_v16 = vld [vmem:[#allocation7 + $0x78] sm:$0xff]   ;;  %v2042_v18 = vld [vmem:[#allocation7 + $0x80] sm:$0xff]  }
  0x3c   :  { %v2041_v17 = vld [vmem:[#allocation2] sm:$0xff]   ;;  %v2043_v19 = vld [vmem:[#allocation7 + $0xc0] sm:$0xff]   ;;  %v2044_v20 = vld [vmem:[#allocation7 + $0x88] sm:$0xff]   ;;  %p2200_p13 = por %p2199_p12, %p2198_p11 }
  0x3d   :  { %1742 = vmatpush3.bf16.msra.mxu0 %v2027_v3  ;;  %1762 = vmatpush3.bf16.msra.mxu1 %v2028_v4  ;;  %v2045_v21 = vld [vmem:[#allocation7 + $0xc8] sm:$0xff]   ;;  %v2046_v22 = vld [vmem:[#allocation7 + $0x90] sm:$0xff]   ;;  %v2048_v24 = vld [vmem:[#allocation7 + $0x98] sm:$0xff]  }
  0x3e   :  { %1743 = vmatprep.subr.bf16.mxu0 %v2226_v0  ;;  %1763 = vmatprep.subr.bf16.mxu1 %v2226_v0  ;;  %v2047_v23 = vld [vmem:[#allocation7 + $0xd0] sm:$0xff]   ;;  %v2049_v25 = vld [vmem:[#allocation7 + $0xd8] sm:$0xff]   ;;  %v2050_v26 = vld [vmem:[#allocation7 + $0xa0] sm:$0xff]   ;;  %p2201_p0 = pnand %p2200_p13, %p2194_p10 }
  0x3f   :  { %v2051_v27 = vld [vmem:[#allocation7 + $0xe0] sm:$0xff]   ;;  %v2052_v28 = vld [vmem:[#allocation7 + $0xa8] sm:$0xff]   ;;  %v2054_v30 = vld [vmem:[#allocation7 + $0xb0] sm:$0xff]  }
  0x40   :  { %v2053_v29 = vld [vmem:[#allocation7 + $0xe8] sm:$0xff]   ;;  %v2055_v31 = vld [vmem:[#allocation7 + $0xf0] sm:$0xff]   ;;  %v2056_v32 = vld [vmem:[#allocation7 + $0xb8] sm:$0xff]  }
  0x41   :  { %1744 = vmatpush3.bf16.msra.mxu0 %v2029_v5  ;;  %1764 = vmatpush3.bf16.msra.mxu1 %v2030_v6  ;;  %v2057_v33 = vld [vmem:[#allocation7 + $0xf8] sm:$0xff]   ;;  %v2059_v34 = vld [vmem:[#allocation7 + $0x100] sm:$0xff]   ;;  %v2061_v35 = vld [vmem:[#allocation7 + $0x108] sm:$0xff]  }
  0x42   :  { %1745 = vmatprep.subr.bf16.mxu0 %v2226_v0  ;;  %1765 = vmatprep.subr.bf16.mxu1 %v2226_v0  ;;  %v2063_v36 = vld [vmem:[#allocation7 + $0x110] sm:$0xff]   ;;  %v2065_v37 = vld [vmem:[#allocation7 + $0x118] sm:$0xff]   ;;  %v2067_v38 = vld [vmem:[#allocation7 + $0x120] sm:$0xff]  }
  0x43   :  { %v2069_v39 = vld [vmem:[#allocation7 + $0x128] sm:$0xff]   ;;  %v2358_v60 = vld [vmem:[#allocation5] sm:$0xff]   ;;  %v2060_v61 = vld [vmem:[#allocation7 + $0x140] sm:$0xff]  }
  0x44   :  { %v2062_v62 = vld [vmem:[#allocation7 + $0x148] sm:$0xff]   ;;  %v2064_v63 = vld [vmem:[#allocation7 + $0x150] sm:$0xff]   ;;  %v2066_v1 = vld [vmem:[#allocation7 + $0x158] sm:$0xff]  }
  0x45   :  { %1746 = vmatpush3.bf16.msra.mxu0 %v2031_v7  ;;  %1766 = vmatpush3.bf16.msra.mxu1 %v2032_v8  ;;  %v2068_v2 = vld [vmem:[#allocation7 + $0x160] sm:$0xff]   ;;  %v2070_v3 = vld [vmem:[#allocation7 + $0x168] sm:$0xff]   ;;  %v2071_v4 = vld [vmem:[#allocation7 + $0x130] sm:$0xff]  }
  0x46   :  { %1747 = vmatprep.subr.bf16.mxu0 %v2226_v0  ;;  %1767 = vmatprep.subr.bf16.mxu1 %v2226_v0  ;;  %v2072_v5 = vld [vmem:[#allocation7 + $0x170] sm:$0xff]   ;;  %v2073_v6 = vld [vmem:[#allocation7 + $0x138] sm:$0xff]  }
  0x47   :  { %v2074_v7 = vld [vmem:[#allocation7 + $0x178] sm:$0xff]  }
  0x49   :  { %1748 = vmatpush3.bf16.msra.mxu0 %v2033_v9  ;;  %1768 = vmatpush3.bf16.msra.mxu1 %v2034_v10 }
  0x4a   :  { %1749 = vmatprep.subr.bf16.mxu0 %v2226_v0  ;;  %1769 = vmatprep.subr.bf16.mxu1 %v2226_v0 }
  0x4d   :  { %1750 = vmatpush3.bf16.msra.mxu0 %v2035_v11  ;;  %1770 = vmatpush3.bf16.msra.mxu1 %v2036_v12 }
  0x4e   :  { %1751 = vmatprep.subr.bf16.mxu0 %v2226_v0  ;;  %1771 = vmatprep.subr.bf16.mxu1 %v2226_v0 }
  0x51   :  { %1752 = vmatpush3.bf16.msra.mxu0 %v2037_v13  ;;  %1772 = vmatpush3.bf16.msra.mxu1 %v2038_v14 }
  0x52   :  { %1753 = vmatprep.subr.bf16.mxu0 %v2226_v0  ;;  %1773 = vmatprep.subr.bf16.mxu1 %v2226_v0 }
  0x55   :  { %1754 = vmatpush3.bf16.msra.mxu0 %v2039_v15  ;;  %1774 = vmatpush3.bf16.msra.mxu1 %v2040_v16  ;;  %v2075_v16 = vld [vmem:[#allocation7 + $0x180] sm:$0xff]  }
  0x56   :  { %1779 = vmatprep.subr.bf16.mxu0 %v2226_v0  ;;  %1799 = vmatprep.subr.bf16.mxu1 %v2226_v0 }
  0x58   :  { %1756 = vmatmul.mubr.bf16.vlgmr.msra.gmra.mrb[0].mxu0 %v2041_v17  ;;  %1776 = vmatmul.mubr.bf16.vlgmr.msra.gmra.mrb[0].mxu1 %v2041_v17 }
  0x59   :  { %1780 = vmatpush3.bf16.msra.mxu0 %v2042_v18  ;;  %1800 = vmatpush3.bf16.msra.mxu1 %v2043_v19  ;;  %v2077_v19 = vld [vmem:[#allocation7 + $0x188] sm:$0xff]  }
  0x5a   :  { %1781 = vmatprep.subr.bf16.mxu0 %v2226_v0  ;;  %1801 = vmatprep.subr.bf16.mxu1 %v2226_v0 }
  0x5b   :  { %1795 = vmatprep.mubr.msk.bf16.mxu0 %vm2227_vm0, %v2226_v0  ;;  %1815 = vmatprep.mubr.msk.bf16.mxu1 %vm2227_vm0, %v2226_v0 }
  0x5d   :  { %1782 = vmatpush3.bf16.msra.mxu0 %v2044_v20  ;;  %1802 = vmatpush3.bf16.msra.mxu1 %v2045_v21  ;;  %v2078_v20 = vld [vmem:[#allocation7 + $0x1c8] sm:$0xff]   ;;  %v2079_v21 = vld [vmem:[#allocation7 + $0x190] sm:$0xff]  }
  0x5e   :  { %1783 = vmatprep.subr.bf16.mxu0 %v2226_v0  ;;  %1803 = vmatprep.subr.bf16.mxu1 %v2226_v0 }
  0x61   :  { %1784 = vmatpush3.bf16.msra.mxu0 %v2046_v22  ;;  %1804 = vmatpush3.bf16.msra.mxu1 %v2047_v23  ;;  %v2080_v22 = vld [vmem:[#allocation7 + $0x1d0] sm:$0xff]   ;;  %v2081_v23 = vld [vmem:[#allocation7 + $0x198] sm:$0xff]  }
  0x62   :  { %1785 = vmatprep.subr.bf16.mxu0 %v2226_v0  ;;  %1805 = vmatprep.subr.bf16.mxu1 %v2226_v0 }
  0x65   :  { %1786 = vmatpush3.bf16.msra.mxu0 %v2048_v24  ;;  %1806 = vmatpush3.bf16.msra.mxu1 %v2049_v25  ;;  %v2082_v24 = vld [vmem:[#allocation7 + $0x1d8] sm:$0xff]   ;;  %v2083_v25 = vld [vmem:[#allocation7 + $0x1a0] sm:$0xff]  }
  0x66   :  { %1787 = vmatprep.subr.bf16.mxu0 %v2226_v0  ;;  %1807 = vmatprep.subr.bf16.mxu1 %v2226_v0 }
  0x69   :  { %1788 = vmatpush3.bf16.msra.mxu0 %v2050_v26  ;;  %1808 = vmatpush3.bf16.msra.mxu1 %v2051_v27  ;;  %v2084_v26 = vld [vmem:[#allocation7 + $0x1e0] sm:$0xff]   ;;  %v2085_v27 = vld [vmem:[#allocation7 + $0x1a8] sm:$0xff]  }
  0x6a   :  { %1789 = vmatprep.subr.bf16.mxu0 %v2226_v0  ;;  %1809 = vmatprep.subr.bf16.mxu1 %v2226_v0 }
  0x6d   :  { %1790 = vmatpush3.bf16.msra.mxu0 %v2052_v28  ;;  %1810 = vmatpush3.bf16.msra.mxu1 %v2053_v29  ;;  %v2086_v28 = vld [vmem:[#allocation7 + $0x1e8] sm:$0xff]   ;;  %v2087_v29 = vld [vmem:[#allocation7 + $0x1b0] sm:$0xff]  }
  0x6e   :  { %1791 = vmatprep.subr.bf16.mxu0 %v2226_v0  ;;  %1811 = vmatprep.subr.bf16.mxu1 %v2226_v0 }
  0x71   :  { %1792 = vmatpush3.bf16.msra.mxu0 %v2054_v30  ;;  %1812 = vmatpush3.bf16.msra.mxu1 %v2055_v31  ;;  %v2088_v30 = vld [vmem:[#allocation7 + $0x1f0] sm:$0xff]   ;;  %v2089_v31 = vld [vmem:[#allocation7 + $0x1b8] sm:$0xff]  }
  0x72   :  { %1793 = vmatprep.subr.bf16.mxu0 %v2226_v0  ;;  %1813 = vmatprep.subr.bf16.mxu1 %v2226_v0 }
  0x75   :  { %1794 = vmatpush3.bf16.msra.mxu0 %v2056_v32  ;;  %1814 = vmatpush3.bf16.msra.mxu1 %v2057_v33  ;;  %v2090_v32 = vld [vmem:[#allocation7 + $0x1f8] sm:$0xff]   ;;  %v2091_v33 = vld [vmem:[#allocation7 + $0x200] sm:$0xff]  }
  0x76   :  { %1819 = vmatprep.subr.bf16.mxu0 %v2226_v0  ;;  %1831 = vmatprep.subr.bf16.mxu1 %v2226_v0 }
  0x78   :  { %1796 = vmatmul.mubr.bf16.vlgmr.msra.gmra.mrb[4].mxu0 %v2041_v17  ;;  %1816 = vmatmul.mubr.bf16.vlgmr.msra.gmra.mrb[4].mxu1 %v2041_v17  ;;  %v2076_v17 = vld [vmem:[#allocation7 + $0x1c0] sm:$0xff]  }
  0x79   :  { %1827 = vmatprep.mubr.msk.bf16.mxu0 %vm2227_vm0, %v2226_v0  ;;  %1847 = vmatprep.mubr.msk.bf16.mxu1 %vm2227_vm0, %v2226_v0 }
  0x7a   :  { %1832 = vmatpush3.bf16.msra.mxu1 %v2059_v34  ;;  %v2093_v34 = vld [vmem:[#allocation7 + $0x208] sm:$0xff]  }
  0x7b   :  { %1833 = vmatprep.subr.bf16.mxu1 %v2226_v0 }
  0x7e   :  { %1834 = vmatpush3.bf16.msra.mxu1 %v2061_v35  ;;  %v2095_v35 = vld [vmem:[#allocation7 + $0x210] sm:$0xff]  }
  0x7f   :  { %1835 = vmatprep.subr.bf16.mxu1 %v2226_v0 }
  0x82   :  { %1836 = vmatpush3.bf16.msra.mxu1 %v2063_v36  ;;  %v2097_v36 = vld [vmem:[#allocation7 + $0x218] sm:$0xff]  }
  0x83   :  { %1837 = vmatprep.subr.bf16.mxu1 %v2226_v0 }
  0x86   :  { %1838 = vmatpush3.bf16.msra.mxu1 %v2065_v37  ;;  %v2099_v37 = vld [vmem:[#allocation7 + $0x220] sm:$0xff]  }
  0x87   :  { %1839 = vmatprep.subr.bf16.mxu1 %v2226_v0 }
  0x8a   :  { %1840 = vmatpush3.bf16.msra.mxu1 %v2067_v38  ;;  %v2101_v38 = vld [vmem:[#allocation7 + $0x228] sm:$0xff]  }
  0x8b   :  { %1841 = vmatprep.subr.bf16.mxu1 %v2226_v0 }
  0x8e   :  { %1842 = vmatpush3.bf16.msra.mxu1 %v2069_v39 }
  0x8f   :  { %1843 = vmatprep.subr.bf16.mxu1 %v2226_v0 }
  0x92   :  { %1844 = vmatpush3.bf16.msra.mxu1 %v2071_v4  ;;  %v2104_v4 = vld [vmem:[#allocation7 + $0x270] sm:$0xff]  }
  0x93   :  { %1845 = vmatprep.subr.bf16.mxu1 %v2226_v0 }
  0x96   :  { %1846 = vmatpush3.bf16.msra.mxu1 %v2073_v6  ;;  %v2106_v6 = vld [vmem:[#allocation7 + $0x278] sm:$0xff]  }
  0x97   :  { %1871 = vmatprep.subr.bf16.mxu1 %v2226_v0 }
 0x12b   :  { %v213_v40 = vpop.f32.mrb[0].mxu0  ;;  %v302_v42 = vpop.f32.mrb[0].mxu1 }
 0x12c   :  { %v1757_v41 = vpop.f32.mrb[1].mxu0  ;;  %v1777_v44 = vpop.f32.mrb[1].mxu1 }
 0x12d   :  { %v216_v43 = vpop.f32.mrb[2].mxu0  ;;  %v305_v47 = vpop.f32.mrb[2].mxu1 }
 0x12e   :  { %v487_v45 = vpack.c.bf16 %v216_v43, %v213_v40  ;;  %v1758_v46 = vpop.f32.mrb[3].mxu0  ;;  %v488_v48 = vpack.c.bf16 %v305_v47, %v302_v42  ;;  %v1778_v49 = vpop.f32.mrb[3].mxu1 }
 0x130   :  { %1820 = vmatpush3.bf16.msra.mxu0 %v487_v45 }
 0x131   :  { %1821 = vmatprep.subr.bf16.mxu0 %v2226_v0 }
 0x134   :  { %1822 = vmatpush3.bf16.msra.mxu0 %v488_v48 }
 0x135   :  { %1823 = vmatprep.subr.bf16.mxu0 %v2226_v0 }
 0x14b   :  { %v391_v50 = vpop.f32.mrb[4].mxu0  ;;  %v480_v52 = vpop.f32.mrb[4].mxu1 }
 0x14c   :  { %v1797_v51 = vpop.f32.mrb[5].mxu0  ;;  %v1817_v54 = vpop.f32.mrb[5].mxu1 }
 0x14d   :  { %v394_v53 = vpop.f32.mrb[6].mxu0  ;;  %v483_v57 = vpop.f32.mrb[6].mxu1 }
 0x14e   :  { %v489_v55 = vpack.c.bf16 %v394_v53, %v391_v50  ;;  %v1798_v56 = vpop.f32.mrb[7].mxu0  ;;  %v490_v58 = vpack.c.bf16 %v483_v57, %v480_v52  ;;  %v1818_v59 = vpop.f32.mrb[7].mxu1 }
 0x14f   :  { %v2092_v59 = vld [vmem:[#allocation7 + $0x240] sm:$0xff]  }
 0x150   :  { %1824 = vmatpush3.bf16.msra.mxu0 %v489_v55 }
 0x151   :  { %1825 = vmatprep.subr.bf16.mxu0 %v2226_v0 }
 0x154   :  { %1826 = vmatpush3.bf16.msra.mxu0 %v490_v58 }
 0x155   :  { %1851 = vmatprep.subr.bf16.mxu0 %v2226_v0 }
 0x157   :  { %1828 = vmatmul.mubr.msk.bf16.vlgmr.msra.gmra.mrb[8].mxu0 %vm496_vm1, %v2358_v60 }
 0x158   :  { %1852 = vmatpush3.bf16.msra.mxu0 %v2060_v61  ;;  %1867 = vmatprep.mubr.msk.bf16.mxu0 %vm2227_vm0, %v2226_v0  ;;  %v2094_v61 = vld [vmem:[#allocation7 + $0x248] sm:$0xff]  }
 0x159   :  { %1853 = vmatprep.subr.bf16.mxu0 %v2226_v0 }
 0x15c   :  { %1854 = vmatpush3.bf16.msra.mxu0 %v2062_v62  ;;  %v2096_v62 = vld [vmem:[#allocation7 + $0x250] sm:$0xff]  }
 0x15d   :  { %1855 = vmatprep.subr.bf16.mxu0 %v2226_v0 }
 0x160   :  { %1856 = vmatpush3.bf16.msra.mxu0 %v2064_v63  ;;  %v2098_v63 = vld [vmem:[#allocation7 + $0x258] sm:$0xff]  }
 0x161   :  { %1857 = vmatprep.subr.bf16.mxu0 %v2226_v0 }
 0x164   :  { %1858 = vmatpush3.bf16.msra.mxu0 %v2066_v1  ;;  %v2100_v1 = vld [vmem:[#allocation7 + $0x260] sm:$0xff]  }
 0x165   :  { %1859 = vmatprep.subr.bf16.mxu0 %v2226_v0 }
 0x168   :  { %1860 = vmatpush3.bf16.msra.mxu0 %v2068_v2  ;;  %v2102_v2 = vld [vmem:[#allocation7 + $0x268] sm:$0xff]  }
 0x169   :  { %1861 = vmatprep.subr.bf16.mxu0 %v2226_v0 }
 0x16c   :  { %1862 = vmatpush3.bf16.msra.mxu0 %v2070_v3  ;;  %v2103_v3 = vld [vmem:[#allocation7 + $0x230] sm:$0xff]  }
 0x16d   :  { %1863 = vmatprep.subr.bf16.mxu0 %v2226_v0 }
 0x170   :  { %1864 = vmatpush3.bf16.msra.mxu0 %v2072_v5  ;;  %v2105_v5 = vld [vmem:[#allocation7 + $0x238] sm:$0xff]  }
 0x171   :  { %1865 = vmatprep.subr.bf16.mxu0 %v2226_v0 }
 0x174   :  { %1866 = vmatpush3.bf16.msra.mxu0 %v2074_v7 }
 0x175   :  { %1891 = vmatprep.subr.bf16.mxu0 %v2226_v0 }
 0x22a   :  { %v534_v8 = vpop.f32.mrb[8].mxu0 }
 0x22b   :  { %v541_v9 = vmul.f32 0.1, %v534_v8  ;;  %v1829_v10 = vpop.f32.mrb[9].mxu0 }
 0x22c   :  { %v537_v11 = vpop.f32.mrb[10].mxu0 }
 0x22d   :  { %v542_v12 = vmul.f32 0.1, %v537_v11  ;;  %v1830_v13 = vpop.f32.mrb[11].mxu0  ;;  %v543_v14 = vmax.f32 %v534_v8, %v541_v9 }
 0x22f   :  { %v544_v15 = vmax.f32 %v537_v11, %v542_v12 }
 0x231   :  { %v610_v18 = vpack.c.bf16 %v544_v15, %v543_v14  ;;  %v2107_v15 = vld [vmem:[#allocation7 + $0x280] sm:$0xff]  }
 0x233   :  { %1848 = vmatmul.mubr.bf16.vlgmr.msra.gmra.mrb[8].mxu1 %v610_v18  ;;  %1868 = vmatmul.mubr.bf16.vlgmr.msra.gmra.mrb[12].mxu0 %v610_v18 }
 0x234   :  { %1872 = vmatpush3.bf16.msra.mxu1 %v2075_v16  ;;  %1892 = vmatpush3.bf16.msra.mxu0 %v2076_v17  ;;  %v2108_v16 = vld [vmem:[#allocation7 + $0x2c0] sm:$0xff]  }
 0x235   :  { %1873 = vmatprep.subr.bf16.mxu1 %v2226_v0  ;;  %1893 = vmatprep.subr.bf16.mxu0 %v2226_v0 }
 0x236   :  { %1887 = vmatprep.mubr.msk.bf16.mxu1 %vm2227_vm0, %v2226_v0  ;;  %1907 = vmatprep.mubr.msk.bf16.mxu0 %vm2227_vm0, %v2226_v0 }
 0x238   :  { %1874 = vmatpush3.bf16.msra.mxu1 %v2077_v19  ;;  %1894 = vmatpush3.bf16.msra.mxu0 %v2078_v20  ;;  %v2110_v19 = vld [vmem:[#allocation7 + $0x2c8] sm:$0xff]   ;;  %v2111_v20 = vld [vmem:[#allocation7 + $0x290] sm:$0xff]  }
 0x239   :  { %1875 = vmatprep.subr.bf16.mxu1 %v2226_v0  ;;  %1895 = vmatprep.subr.bf16.mxu0 %v2226_v0 }
 0x23c   :  { %1876 = vmatpush3.bf16.msra.mxu1 %v2079_v21  ;;  %1896 = vmatpush3.bf16.msra.mxu0 %v2080_v22  ;;  %v2112_v21 = vld [vmem:[#allocation7 + $0x2d0] sm:$0xff]   ;;  %v2113_v22 = vld [vmem:[#allocation7 + $0x298] sm:$0xff]  }
 0x23d   :  { %1877 = vmatprep.subr.bf16.mxu1 %v2226_v0  ;;  %1897 = vmatprep.subr.bf16.mxu0 %v2226_v0 }
 0x240   :  { %1878 = vmatpush3.bf16.msra.mxu1 %v2081_v23  ;;  %1898 = vmatpush3.bf16.msra.mxu0 %v2082_v24  ;;  %v2114_v23 = vld [vmem:[#allocation7 + $0x2d8] sm:$0xff]   ;;  %v2115_v24 = vld [vmem:[#allocation7 + $0x2a0] sm:$0xff]  }
 0x241   :  { %1879 = vmatprep.subr.bf16.mxu1 %v2226_v0  ;;  %1899 = vmatprep.subr.bf16.mxu0 %v2226_v0 }
 0x244   :  { %1880 = vmatpush3.bf16.msra.mxu1 %v2083_v25  ;;  %1900 = vmatpush3.bf16.msra.mxu0 %v2084_v26  ;;  %v2116_v25 = vld [vmem:[#allocation7 + $0x2e0] sm:$0xff]   ;;  %v2117_v26 = vld [vmem:[#allocation7 + $0x2a8] sm:$0xff]  }
 0x245   :  { %1881 = vmatprep.subr.bf16.mxu1 %v2226_v0  ;;  %1901 = vmatprep.subr.bf16.mxu0 %v2226_v0 }
 0x248   :  { %1882 = vmatpush3.bf16.msra.mxu1 %v2085_v27  ;;  %1902 = vmatpush3.bf16.msra.mxu0 %v2086_v28  ;;  %v2118_v27 = vld [vmem:[#allocation7 + $0x2e8] sm:$0xff]   ;;  %v2119_v28 = vld [vmem:[#allocation7 + $0x2b0] sm:$0xff]  }
 0x249   :  { %1883 = vmatprep.subr.bf16.mxu1 %v2226_v0  ;;  %1903 = vmatprep.subr.bf16.mxu0 %v2226_v0 }
 0x24c   :  { %1884 = vmatpush3.bf16.msra.mxu1 %v2087_v29  ;;  %1904 = vmatpush3.bf16.msra.mxu0 %v2088_v30  ;;  %v2120_v29 = vld [vmem:[#allocation7 + $0x2f0] sm:$0xff]   ;;  %v2121_v30 = vld [vmem:[#allocation7 + $0x2b8] sm:$0xff]  }
 0x24d   :  { %1885 = vmatprep.subr.bf16.mxu1 %v2226_v0  ;;  %1905 = vmatprep.subr.bf16.mxu0 %v2226_v0 }
 0x250   :  { %1886 = vmatpush3.bf16.msra.mxu1 %v2089_v31  ;;  %1906 = vmatpush3.bf16.msra.mxu0 %v2090_v32  ;;  %v2122_v31 = vld [vmem:[#allocation7 + $0x2f8] sm:$0xff]  }
 0x251   :  { %1911 = vmatprep.subr.bf16.mxu1 %v2226_v0  ;;  %1923 = vmatprep.subr.bf16.mxu0 %v2226_v0 }
 0x253   :  { %1888 = vmatmul.mubr.bf16.vlgmr.msra.gmra.mrb[12].mxu1 %v610_v18  ;;  %1908 = vmatmul.mubr.bf16.vlgmr.msra.gmra.mrb[16].mxu0 %v610_v18  ;;  %v2109_v18 = vld [vmem:[#allocation7 + $0x288] sm:$0xff]  }
 0x254   :  { %1919 = vmatprep.mubr.msk.bf16.mxu1 %vm2227_vm0, %v2226_v0  ;;  %1939 = vmatprep.mubr.msk.bf16.mxu0 %vm2227_vm0, %v2226_v0 }
 0x255   :  { %1924 = vmatpush3.bf16.msra.mxu0 %v2091_v33 }
 0x256   :  { %1925 = vmatprep.subr.bf16.mxu0 %v2226_v0 }
 0x259   :  { %1926 = vmatpush3.bf16.msra.mxu0 %v2093_v34 }
 0x25a   :  { %1927 = vmatprep.subr.bf16.mxu0 %v2226_v0 }
 0x25d   :  { %1928 = vmatpush3.bf16.msra.mxu0 %v2095_v35 }
 0x25e   :  { %1929 = vmatprep.subr.bf16.mxu0 %v2226_v0 }
 0x261   :  { %1930 = vmatpush3.bf16.msra.mxu0 %v2097_v36 }
 0x262   :  { %1931 = vmatprep.subr.bf16.mxu0 %v2226_v0 }
 0x265   :  { %1932 = vmatpush3.bf16.msra.mxu0 %v2099_v37 }
 0x266   :  { %1933 = vmatprep.subr.bf16.mxu0 %v2226_v0 }
 0x269   :  { %1934 = vmatpush3.bf16.msra.mxu0 %v2101_v38 }
 0x26a   :  { %1935 = vmatprep.subr.bf16.mxu0 %v2226_v0 }
 0x26d   :  { %1936 = vmatpush3.bf16.msra.mxu0 %v2103_v3 }
 0x26e   :  { %1937 = vmatprep.subr.bf16.mxu0 %v2226_v0 }
 0x271   :  { %1938 = vmatpush3.bf16.msra.mxu0 %v2105_v5 }
 0x272   :  { %1963 = vmatprep.subr.bf16.mxu0 %v2226_v0 }
 0x306   :  { %v693_v39 = vpop.f32.mrb[8].mxu1  ;;  %v782_v40 = vpop.f32.mrb[12].mxu0 }
 0x307   :  { %v1849_v41 = vpop.f32.mrb[9].mxu1  ;;  %v1869_v42 = vpop.f32.mrb[13].mxu0 }
 0x308   :  { %v696_v43 = vpop.f32.mrb[10].mxu1  ;;  %v785_v44 = vpop.f32.mrb[14].mxu0 }
 0x309   :  { %v967_v45 = vpack.c.bf16 %v696_v43, %v693_v39  ;;  %v968_v46 = vpack.c.bf16 %v785_v44, %v782_v40  ;;  %v1850_v47 = vpop.f32.mrb[11].mxu1  ;;  %v1870_v48 = vpop.f32.mrb[15].mxu0 }
 0x30b   :  { %1912 = vmatpush3.bf16.msra.mxu1 %v967_v45 }
 0x30c   :  { %1913 = vmatprep.subr.bf16.mxu1 %v2226_v0 }
 0x30f   :  { %1914 = vmatpush3.bf16.msra.mxu1 %v968_v46 }
 0x310   :  { %1915 = vmatprep.subr.bf16.mxu1 %v2226_v0 }
 0x326   :  { %v871_v49 = vpop.f32.mrb[12].mxu1  ;;  %v960_v50 = vpop.f32.mrb[16].mxu0 }
 0x327   :  { %v1889_v51 = vpop.f32.mrb[13].mxu1  ;;  %v1909_v52 = vpop.f32.mrb[17].mxu0 }
 0x328   :  { %v874_v53 = vpop.f32.mrb[14].mxu1  ;;  %v963_v54 = vpop.f32.mrb[18].mxu0 }
 0x329   :  { %v969_v55 = vpack.c.bf16 %v874_v53, %v871_v49  ;;  %v970_v56 = vpack.c.bf16 %v963_v54, %v960_v50  ;;  %v1890_v57 = vpop.f32.mrb[15].mxu1  ;;  %v1910_v58 = vpop.f32.mrb[19].mxu0 }
 0x32b   :  { %1916 = vmatpush3.bf16.msra.mxu1 %v969_v55 }
 0x32c   :  { %1917 = vmatprep.subr.bf16.mxu1 %v2226_v0 }
 0x32f   :  { %1918 = vmatpush3.bf16.msra.mxu1 %v970_v56 }
 0x330   :  { %1943 = vmatprep.subr.bf16.mxu1 %v2226_v0 }
 0x332   :  { %1920 = vmatmul.mubr.msk.bf16.vlgmr.msra.gmra.mrb[16].mxu1 %vm496_vm1, %v2358_v60 }
 0x333   :  { %1944 = vmatpush3.bf16.msra.mxu1 %v2092_v59  ;;  %1959 = vmatprep.mubr.msk.bf16.mxu1 %vm2227_vm0, %v2226_v0 }
 0x334   :  { %1945 = vmatprep.subr.bf16.mxu1 %v2226_v0 }
 0x337   :  { %1946 = vmatpush3.bf16.msra.mxu1 %v2094_v61 }
 0x338   :  { %1947 = vmatprep.subr.bf16.mxu1 %v2226_v0 }
 0x33b   :  { %1948 = vmatpush3.bf16.msra.mxu1 %v2096_v62 }
 0x33c   :  { %1949 = vmatprep.subr.bf16.mxu1 %v2226_v0 }
 0x33f   :  { %1950 = vmatpush3.bf16.msra.mxu1 %v2098_v63 }
 0x340   :  { %1951 = vmatprep.subr.bf16.mxu1 %v2226_v0 }
 0x343   :  { %1952 = vmatpush3.bf16.msra.mxu1 %v2100_v1 }
 0x344   :  { %1953 = vmatprep.subr.bf16.mxu1 %v2226_v0 }
 0x347   :  { %1954 = vmatpush3.bf16.msra.mxu1 %v2102_v2 }
 0x348   :  { %1955 = vmatprep.subr.bf16.mxu1 %v2226_v0 }
 0x34b   :  { %1956 = vmatpush3.bf16.msra.mxu1 %v2104_v4 }
 0x34c   :  { %1957 = vmatprep.subr.bf16.mxu1 %v2226_v0 }
 0x34f   :  { %1958 = vmatpush3.bf16.msra.mxu1 %v2106_v6 }
 0x350   :  { %1983 = vmatprep.subr.bf16.mxu1 %v2226_v0 }
 0x405   :  { %v1005_v7 = vpop.f32.mrb[16].mxu1 }
 0x406   :  { %v1012_v8 = vmul.f32 0.1, %v1005_v7  ;;  %v1921_v9 = vpop.f32.mrb[17].mxu1 }
 0x407   :  { %v1008_v10 = vpop.f32.mrb[18].mxu1 }
 0x408   :  { %v1013_v11 = vmul.f32 0.1, %v1008_v10  ;;  %v1922_v12 = vpop.f32.mrb[19].mxu1  ;;  %v1014_v13 = vmax.f32 %v1005_v7, %v1012_v8 }
 0x40a   :  { %v1015_v14 = vmax.f32 %v1008_v10, %v1013_v11 }
 0x40c   :  { %v1081_v17 = vpack.c.bf16 %v1015_v14, %v1014_v13 }
 0x40e   :  { %1940 = vmatmul.mubr.bf16.vlgmr.msra.gmra.mrb[20].mxu0 %v1081_v17  ;;  %1960 = vmatmul.mubr.bf16.vlgmr.msra.gmra.mrb[20].mxu1 %v1081_v17 }
 0x40f   :  { %1964 = vmatpush3.bf16.msra.mxu0 %v2107_v15  ;;  %1984 = vmatpush3.bf16.msra.mxu1 %v2108_v16 }
 0x410   :  { %1965 = vmatprep.subr.bf16.mxu0 %v2226_v0  ;;  %1985 = vmatprep.subr.bf16.mxu1 %v2226_v0 }
 0x411   :  { %1979 = vmatprep.mubr.msk.bf16.mxu0 %vm2227_vm0, %v2226_v0  ;;  %1999 = vmatprep.mubr.msk.bf16.mxu1 %vm2227_vm0, %v2226_v0 }
 0x413   :  { %1966 = vmatpush3.bf16.msra.mxu0 %v2109_v18  ;;  %1986 = vmatpush3.bf16.msra.mxu1 %v2110_v19 }
 0x414   :  { %1967 = vmatprep.subr.bf16.mxu0 %v2226_v0  ;;  %1987 = vmatprep.subr.bf16.mxu1 %v2226_v0 }
 0x417   :  { %1968 = vmatpush3.bf16.msra.mxu0 %v2111_v20  ;;  %1988 = vmatpush3.bf16.msra.mxu1 %v2112_v21 }
 0x418   :  { %1969 = vmatprep.subr.bf16.mxu0 %v2226_v0  ;;  %1989 = vmatprep.subr.bf16.mxu1 %v2226_v0 }
 0x41b   :  { %1970 = vmatpush3.bf16.msra.mxu0 %v2113_v22  ;;  %1990 = vmatpush3.bf16.msra.mxu1 %v2114_v23 }
 0x41c   :  { %1971 = vmatprep.subr.bf16.mxu0 %v2226_v0  ;;  %1991 = vmatprep.subr.bf16.mxu1 %v2226_v0 }
 0x41f   :  { %1972 = vmatpush3.bf16.msra.mxu0 %v2115_v24  ;;  %1992 = vmatpush3.bf16.msra.mxu1 %v2116_v25 }
 0x420   :  { %1973 = vmatprep.subr.bf16.mxu0 %v2226_v0  ;;  %1993 = vmatprep.subr.bf16.mxu1 %v2226_v0 }
 0x423   :  { %1974 = vmatpush3.bf16.msra.mxu0 %v2117_v26  ;;  %1994 = vmatpush3.bf16.msra.mxu1 %v2118_v27 }
 0x424   :  { %1975 = vmatprep.subr.bf16.mxu0 %v2226_v0  ;;  %1995 = vmatprep.subr.bf16.mxu1 %v2226_v0 }
 0x427   :  { %1976 = vmatpush3.bf16.msra.mxu0 %v2119_v28  ;;  %1996 = vmatpush3.bf16.msra.mxu1 %v2120_v29 }
 0x428   :  { %1977 = vmatprep.subr.bf16.mxu0 %v2226_v0  ;;  %1997 = vmatprep.subr.bf16.mxu1 %v2226_v0 }
 0x42b   :  { %1978 = vmatpush3.bf16.msra.mxu0 %v2121_v30  ;;  %1998 = vmatpush3.bf16.msra.mxu1 %v2122_v31 }
 0x42c   :  { %2003 = vmatprep.subr.bf16.mxu0 %v2226_v0 }
 0x42e   :  { %1980 = vmatmul.mubr.bf16.vlgmr.msra.gmra.mrb[24].mxu0 %v1081_v17  ;;  %2000 = vmatmul.mubr.bf16.vlgmr.msra.gmra.mrb[24].mxu1 %v1081_v17 }
 0x42f   :  { %2011 = vmatprep.mubr.msk.bf16.mxu0 %vm2227_vm0, %v2226_v0 }
 0x4e1   :  { %v1164_v32 = vpop.f32.mrb[20].mxu0  ;;  %v1253_v33 = vpop.f32.mrb[20].mxu1 }
 0x4e2   :  { %v1941_v34 = vpop.f32.mrb[21].mxu0  ;;  %v1961_v35 = vpop.f32.mrb[21].mxu1 }
 0x4e3   :  { %v1167_v36 = vpop.f32.mrb[22].mxu0  ;;  %v1256_v37 = vpop.f32.mrb[22].mxu1 }
 0x4e4   :  { %v1438_v38 = vpack.c.bf16 %v1167_v36, %v1164_v32  ;;  %v1439_v39 = vpack.c.bf16 %v1256_v37, %v1253_v33  ;;  %v1942_v40 = vpop.f32.mrb[23].mxu0  ;;  %v1962_v41 = vpop.f32.mrb[23].mxu1 }
 0x4e6   :  { %2004 = vmatpush3.bf16.msra.mxu0 %v1438_v38 }
 0x4e7   :  { %2005 = vmatprep.subr.bf16.mxu0 %v2226_v0 }
 0x4ea   :  { %2006 = vmatpush3.bf16.msra.mxu0 %v1439_v39 }
 0x4eb   :  { %2007 = vmatprep.subr.bf16.mxu0 %v2226_v0 }
 0x501   :  { %v1342_v42 = vpop.f32.mrb[24].mxu0  ;;  %v1431_v43 = vpop.f32.mrb[24].mxu1 }
 0x502   :  { %v1981_v44 = vpop.f32.mrb[25].mxu0  ;;  %v2001_v45 = vpop.f32.mrb[25].mxu1 }
 0x503   :  { %v1345_v46 = vpop.f32.mrb[26].mxu0  ;;  %v1434_v47 = vpop.f32.mrb[26].mxu1 }
 0x504   :  { %v1440_v48 = vpack.c.bf16 %v1345_v46, %v1342_v42  ;;  %v1441_v49 = vpack.c.bf16 %v1434_v47, %v1431_v43  ;;  %v1982_v50 = vpop.f32.mrb[27].mxu0  ;;  %v2002_v51 = vpop.f32.mrb[27].mxu1 }
 0x506   :  { %2008 = vmatpush3.bf16.msra.mxu0 %v1440_v48 }
 0x507   :  { %2009 = vmatprep.subr.bf16.mxu0 %v2226_v0 }
 0x50a   :  { %2010 = vmatpush3.bf16.msra.mxu0 %v1441_v49 }
 0x50d   :  { %2012 = vmatmul.mubr.msk.bf16.vlgmr.msra.gmra.mrb[28].mxu0 %vm496_vm1, %v2358_v60 }
 0x5e0   :  { %v1476_v52 = vpop.f32.mrb[28].mxu0 }
 0x5e1   :  { %v2013_v53 = vpop.f32.mrb[29].mxu0  ;;  %v1483_v54 = vmul.f32 %v1476_v52, %v1476_v52 }
 0x5e2   :  { %v1479_v55 = vpop.f32.mrb[30].mxu0 }
 0x5e3   :  { %1485 = vadd.xlane.f32.xlu0 %v1483_v54  ;;  %v2014_v56 = vpop.f32.mrb[31].mxu0  ;;  %v1484_v57 = vmul.f32 %v1479_v55, %v1479_v55 }
 0x5e7   :  { %1487 = vadd.xlane.f32.xlu0 %v1484_v57 }
 0x670   :  { %v1486_v58 = vpop.xlane.xlu0 %1485 }
 0x671   :  { %v1489_v59 = vmax.f32 %v1486_v58, 1e-24 }
 0x673   :  { %2123 = vrsqrt.f32 %v1489_v59 }
 0x674   :  { %v1488_v61 = vpop.xlane.xlu0 %1487 }
 0x675   :  { %v1490_v62 = vmax.f32 %v1488_v61, 1e-24 }
 0x677   :  { %2125 = vrsqrt.f32 %v1490_v62 }
 0x67d   :  { %v2124_v63 = vpop.eup %2123 }
 0x67e   :  { %v1493_v0 = vmul.f32 %v2124_v63, %v1476_v52 }
 0x680   :  { %1495 = vst [vmem:[#allocation8] sm:$0xff] %v1493_v0 }
 0x681   :  { %v2126_v60 = vpop.eup %2125 }
 0x682   :  { %v1494_v1 = vmul.f32 %v2126_v60, %v1479_v55 }
 0x684   :  { %1496 = vst [vmem:[#allocation8 + $0x8] sm:$0xff] %v1494_v1 }
 0x685   :  { %2204 = shalt.err (!%p2201_p0)
}
 0x686   :  { %s2205_s25 = scalar_lea.hbm %s2464_s3, 256 }
 0x687   :  { %p2206_p1 = scmp.ne.s32.totalorder %s2464_s3, %s2205_s25  ;;  %p2209_p2 = scmp.lt.u32.totalorder %s2205_s25, %s2464_s3 }
 0x689   :  { %p2211_p3 = pnand %p2209_p2, %p2206_p1 }
 0x68b   :  { %2214 = shalt.err (!%p2211_p3)
}
 0x68c   :  { %s2229_s30 = smov 128   ;;  %s2230_s4 = smov 8  }
 0x68d   :  { %1508 = dma.vmem_to_hbm [thread:$0]  %s1503_s21, 256, %s2464_s3, [#allocation4], %s2229_s30, %s2229_s30, %s2230_s4  }
 0x68e   :  { %2219 = dma.done.wait [#allocation4], 256  }
 0x68f   :  { %2220 = vsyncadd [#allocation4], 4294967040 }
 0x690   :  { %1512 = vsyncpa [#allocation3], 1 }
 0x691   :  { %1513 = vsyncpa [#allocation6], 1 }
 0x692   :  { %1514 = vsyncpa [#allocation4], 1 }

</bundles_post_ra>
